<compile_context>
chip_gen: v7x
topology: tpu7x:2x2x1
jax: 0.10.0
libtpu: 0.0.40
codegen_flags: <defaults>
</compile_context>

<pallas_src>
import jax
import jax.numpy as jnp
from jax.experimental import pallas as pl
from jax.experimental.pallas import tpu as pltpu


def _round_up(n: int, m: int) -> int:
    return ((n + m - 1) // m) * m


def _pick_batch_tile(batch: int) -> int:
    # Multiples of 16 keep bf16 sublane tiling happy for non-full blocks;
    # otherwise fall back to a single full-batch block.
    for t in (1024, 512, 256, 128, 64, 32, 16):
        if batch % t == 0:
            return t
    return batch


def _make_decoder_kernel(hp: int):
    """hp = per-gate lane-padded width (multiple of 128)."""

    def kernel(xh_ref, h_ref, w_ref, b_ref, wl_ref, bl_ref, out_ref, hout_ref):
        # Single fused MXU matmul for all gate pre-activations, f32 accumulate.
        # Result lanes: [ i_r+h_r | i_z+h_z | i_n | h_n ], each slab `hp` wide.
        g = jnp.dot(xh_ref[...], w_ref[...],
                    preferred_element_type=jnp.float32) + b_ref[...]

        # Lane-aligned slices (multiples of 128) -> free vreg selects.
        r = jax.nn.sigmoid(g[:, 0:hp])
        z = jax.nn.sigmoid(g[:, hp:2 * hp])
        n = jnp.tanh(g[:, 2 * hp:3 * hp] + r * g[:, 3 * hp:4 * hp])

        h_new = (1.0 - z) * n + z * h_ref[...]
        hout_ref[...] = h_new

        # Linear(H -> 1): VPU multiply + lane reduce (avoid N=1 MXU matmul).
        out_ref[...] = (jnp.sum(h_new * wl_ref[...], axis=-1, keepdims=True)
                        + bl_ref[...])

    return kernel


def prepare_params(params, num_features: int, hidden_size: int,
                   mxu_dtype=jnp.bfloat16):
    """One-time packing of GRUCell/Linear weights (hoisted out of the step path).

    Returns only device arrays, so `decoder_forward` stays jit-friendly.
    """
    f, h = num_features, hidden_size
    hp = _round_up(h, 128)          # lane-aligned per-gate slab width
    k = f + h
    kp = _round_up(k, 128)          # padded contraction dim (zeros are inert)

    w_ih = params["weight_ih"].astype(jnp.float32)   # (3H, F)  rows: [r | z | n]
    w_hh = params["weight_hh"].astype(jnp.float32)   # (3H, H)
    b_ih = params["bias_ih"].astype(jnp.float32)     # (3H,)
    b_hh = params["bias_hh"].astype(jnp.float32)     # (3H,)

    def pad_cols(m):                                 # (rows, H) -> (rows, Hp)
        return jnp.pad(m, ((0, 0), (0, hp - h)))

    wx_r, wx_z, wx_n = (pad_cols(w_ih[i * h:(i + 1) * h].T) for i in range(3))
    wh_r, wh_z, wh_n = (pad_cols(w_hh[i * h:(i + 1) * h].T) for i in range(3))
    zx = jnp.zeros((f, hp), jnp.float32)
    zh = jnp.zeros((h, hp), jnp.float32)

    # Stacked weight (K, 4*Hp): slabs [r_sum | z_sum | i_n | h_n].
    top = jnp.concatenate([wx_r, wx_z, wx_n, zx], axis=1)   # x-side rows
    bot = jnp.concatenate([wh_r, wh_z, zh, wh_n], axis=1)   # h-side rows
    w_cat = jnp.concatenate([top, bot], axis=0)
    w_cat = jnp.pad(w_cat, ((0, kp - k), (0, 0))).astype(mxu_dtype)

    def pad_vec(v):
        return jnp.pad(v, (0, hp - h))

    b_cat = jnp.concatenate([
        pad_vec(b_ih[0:h] + b_hh[0:h]),           # reset  (pre-summed)
        pad_vec(b_ih[h:2 * h] + b_hh[h:2 * h]),   # update (pre-summed)
        pad_vec(b_ih[2 * h:3 * h]),               # b_in   (kept separate)
        pad_vec(b_hh[2 * h:3 * h]),               # b_hn   (kept separate)
    ]).reshape(1, 4 * hp).astype(jnp.float32)

    wl = jnp.pad(params["l1_weight"].astype(jnp.float32),
                 ((0, 0), (0, hp - h)))           # (1, Hp)
    bl = params["l1_bias"].reshape(1, 1).astype(jnp.float32)

    return {"w_cat": w_cat, "b_cat": b_cat, "wl": wl, "bl": bl}


def decoder_forward(x, hidden, prep):
    """Fused Pallas forward.  x:(B,F) f32, hidden:(B,H) f32.

    Returns (output (B,1) f32, new_hidden (B,H) f32).
    """
    b, f = x.shape
    h = hidden.shape[1]
    hp = prep["wl"].shape[1]
    kp = prep["w_cat"].shape[0]
    mxu_dtype = prep["w_cat"].dtype

    # Per-step input prep (cheap, fused by XLA under jit): concat, pad, cast.
    xh = jnp.concatenate([x, hidden], axis=1)
    xh = jnp.pad(xh, ((0, 0), (0, kp - (f + h)))).astype(mxu_dtype)
    h_p = jnp.pad(hidden, ((0, 0), (0, hp - h)))            # f32, padded lanes 0

    tb = _pick_batch_tile(b)
    grid = (b // tb,)

    out, h_new_p = pl.pallas_call(
        _make_decoder_kernel(hp),
        out_shape=(
            jax.ShapeDtypeStruct((b, 1), jnp.float32),
            jax.ShapeDtypeStruct((b, hp), jnp.float32),
        ),
        grid=grid,
        in_specs=[
            pl.BlockSpec((tb, kp), lambda i: (i, 0)),        # [x|h] tile
            pl.BlockSpec((tb, hp), lambda i: (i, 0)),        # h (f32) tile
            pl.BlockSpec((kp, 4 * hp), lambda i: (0, 0)),    # weights: resident
            pl.BlockSpec((1, 4 * hp), lambda i: (0, 0)),     # fused bias
            pl.BlockSpec((1, hp), lambda i: (0, 0)),         # l1 weight row
            pl.BlockSpec((1, 1), lambda i: (0, 0)),          # l1 bias
        ],
        out_specs=(
            pl.BlockSpec((tb, 1), lambda i: (i, 0)),
            pl.BlockSpec((tb, hp), lambda i: (i, 0)),
        ),
        compiler_params=pltpu.CompilerParams(
            dimension_semantics=("parallel",)),
    )(xh, h_p, prep["w_cat"], prep["b_cat"], prep["wl"], prep["bl"])

    return out, h_new_p[:, :h]


def init_params(key, num_features, hidden_size):
    """Deterministic parameter init matching nn.GRUCell / nn.Linear shapes."""
    ks = jax.random.split(key, 6)
    k = 1.0 / jnp.sqrt(hidden_size)
    u = lambda kk, shape: jax.random.uniform(kk, shape, jnp.float32, -k, k)
    return {
        "weight_ih": u(ks[0], (3 * hidden_size, num_features)),
        "weight_hh": u(ks[1], (3 * hidden_size, hidden_size)),
        "bias_ih":   u(ks[2], (3 * hidden_size,)),
        "bias_hh":   u(ks[3], (3 * hidden_size,)),
        "l1_weight": u(ks[4], (1, hidden_size)),
        "l1_bias":   u(ks[5], (1,)),
    }


def _reference(x, h, p, mxu_dtype=jnp.bfloat16):
    """Pure-JAX reference of the PyTorch Decoder forward (eval mode), with the
    same bf16-input / f32-accumulate matmul quantization as the kernel."""
    hd = h.shape[1]
    q = lambda a: a.astype(mxu_dtype).astype(jnp.float32)
    gi = q(x) @ q(p["weight_ih"]).T + p["bias_ih"]
    gh = q(h) @ q(p["weight_hh"]).T + p["bias_hh"]
    r = jax.nn.sigmoid(gi[:, :hd] + gh[:, :hd])
    z = jax.nn.sigmoid(gi[:, hd:2 * hd] + gh[:, hd:2 * hd])
    n = jnp.tanh(gi[:, 2 * hd:] + r * gh[:, 2 * hd:])
    h_new = (1.0 - z) * n + z * h
    out = h_new @ p["l1_weight"].T + p["l1_bias"]
    return out, h_new


if __name__ == "__main__":
    B, F, H = 8, 16, 32
    key = jax.random.PRNGKey(0)
    kx, kh, kp = jax.random.split(key, 3)

    x = jax.random.normal(kx, (B, F), jnp.float32)
    hidden = jax.random.normal(kh, (B, H), jnp.float32)
    raw_params = init_params(kp, F, H)

    # One-time weight packing (outside any decode loop).
    prep = prepare_params(raw_params, F, H)
    fwd = jax.jit(decoder_forward)

    out, h_new = fwd(x, hidden, prep)
    jax.block_until_ready((out, h_new))

    ref_out, ref_h = _reference(x, hidden, raw_params)
    assert out.shape == (B, 1) and h_new.shape == (B, H)
    assert jnp.allclose(h_new, ref_h, atol=1e-4, rtol=1e-4), "hidden mismatch"
    assert jnp.allclose(out, ref_out, atol=1e-4, rtol=1e-4), "output mismatch"

    print("KERNEL_OK")
</pallas_src>

<mosaic_0001>
module attributes {stable_mosaic.version = 11 : i64} {
  func.func @kernel(%arg0: i32, %arg1: memref<8x128xbf16, #tpu.memory_space<vmem>>, %arg2: memref<8x128xf32, #tpu.memory_space<vmem>>, %arg3: memref<128x512xbf16, #tpu.memory_space<vmem>>, %arg4: memref<1x512xf32, #tpu.memory_space<vmem>>, %arg5: memref<1x128xf32, #tpu.memory_space<vmem>>, %arg6: memref<1x1xf32, #tpu.memory_space<vmem>>, %arg7: memref<8x1xf32, #tpu.memory_space<vmem>>, %arg8: memref<8x128xf32, #tpu.memory_space<vmem>>) attributes {dimension_semantics = [#tpu.dimension_semantics<parallel>], iteration_bounds = array<i64: 1>, scalar_prefetch = 0 : i64, scratch_operands = 0 : i64, tpu.core_type = #tpu.core_type<tc>, window_params = [{transform_indices = @transform_0, window_bounds = array<i64: 8, 128>}, {transform_indices = @transform_1, window_bounds = array<i64: 8, 128>}, {pipeline_mode = #tpu.pipeline_mode<synchronous>, transform_indices = @transform_2, window_bounds = array<i64: 128, 512>}, {pipeline_mode = #tpu.pipeline_mode<synchronous>, transform_indices = @transform_3, window_bounds = array<i64: 1, 512>}, {pipeline_mode = #tpu.pipeline_mode<synchronous>, transform_indices = @transform_4, window_bounds = array<i64: 1, 128>}, {pipeline_mode = #tpu.pipeline_mode<synchronous>, transform_indices = @transform_5, window_bounds = array<i64: 1, 1>}, {transform_indices = @transform_6, window_bounds = array<i64: 8, 1>}, {transform_indices = @transform_7, window_bounds = array<i64: 8, 128>}]} {
    %c0 = arith.constant 0 : index
    %c0_0 = arith.constant 0 : index
    %0 = vector.load %arg1[%c0, %c0_0] : memref<8x128xbf16, #tpu.memory_space<vmem>>, vector<8x128xbf16>
    %c0_1 = arith.constant 0 : index
    %c0_2 = arith.constant 0 : index
    %1 = vector.load %arg3[%c0_1, %c0_2] : memref<128x512xbf16, #tpu.memory_space<vmem>>, vector<128x512xbf16>
    %cst = arith.constant dense<0.000000e+00> : vector<8x512xf32>
    %2 = tpu.matmul %0, %1, %cst {dimension_numbers = #tpu.dot_dimension_numbers<[1], [0], [0], [1], [0, 0, 1, 1], [], []>} : vector<8x128xbf16>, vector<128x512xbf16>, vector<8x512xf32> -> vector<8x512xf32>
    %c0_3 = arith.constant 0 : index
    %c0_4 = arith.constant 0 : index
    %3 = vector.load %arg4[%c0_3, %c0_4] : memref<1x512xf32, #tpu.memory_space<vmem>>, vector<1x512xf32>
    %4 = vector.broadcast %3 : vector<1x512xf32> to vector<8x512xf32>
    %5 = arith.addf %2, %4 : vector<8x512xf32>
    %6 = vector.extract_strided_slice %5 {offsets = [0, 0], sizes = [8, 128], strides = [1, 1]} : vector<8x512xf32> to vector<8x128xf32>
    %7 = arith.negf %6 : vector<8x128xf32>
    %8 = math.exp %7 : vector<8x128xf32>
    %cst_5 = arith.constant 1.000000e+00 : f32
    %9 = vector.broadcast %cst_5 : f32 to vector<8x128xf32>
    %10 = arith.addf %9, %8 : vector<8x128xf32>
    %11 = arith.divf %9, %10 : vector<8x128xf32>
    %12 = vector.extract_strided_slice %5 {offsets = [0, 128], sizes = [8, 128], strides = [1, 1]} : vector<8x512xf32> to vector<8x128xf32>
    %13 = arith.negf %12 : vector<8x128xf32>
    %14 = math.exp %13 : vector<8x128xf32>
    %cst_6 = arith.constant 1.000000e+00 : f32
    %15 = vector.broadcast %cst_6 : f32 to vector<8x128xf32>
    %16 = arith.addf %15, %14 : vector<8x128xf32>
    %17 = arith.divf %15, %16 : vector<8x128xf32>
    %18 = vector.extract_strided_slice %5 {offsets = [0, 256], sizes = [8, 128], strides = [1, 1]} : vector<8x512xf32> to vector<8x128xf32>
    %19 = vector.extract_strided_slice %5 {offsets = [0, 384], sizes = [8, 128], strides = [1, 1]} : vector<8x512xf32> to vector<8x128xf32>
    %20 = arith.mulf %11, %19 : vector<8x128xf32>
    %21 = arith.addf %18, %20 : vector<8x128xf32>
    %22 = math.tanh %21 : vector<8x128xf32>
    %cst_7 = arith.constant 1.000000e+00 : f32
    %23 = vector.broadcast %cst_7 : f32 to vector<8x128xf32>
    %24 = arith.subf %23, %17 : vector<8x128xf32>
    %25 = arith.mulf %24, %22 : vector<8x128xf32>
    %c0_8 = arith.constant 0 : index
    %c0_9 = arith.constant 0 : index
    %26 = vector.load %arg2[%c0_8, %c0_9] : memref<8x128xf32, #tpu.memory_space<vmem>>, vector<8x128xf32>
    %27 = arith.mulf %17, %26 : vector<8x128xf32>
    %28 = arith.addf %25, %27 : vector<8x128xf32>
    %c0_10 = arith.constant 0 : index
    %c0_11 = arith.constant 0 : index
    %29 = vector.load %arg8[%c0_10, %c0_11] : memref<8x128xf32, #tpu.memory_space<vmem>>, vector<8x128xf32>
    tpu.vector_store %arg8[%c0_10, %c0_11], %28 {strides = array<i32>} : memref<8x128xf32, #tpu.memory_space<vmem>>, vector<8x128xf32>,
    %c0_12 = arith.constant 0 : index
    %c0_13 = arith.constant 0 : index
    %30 = vector.load %arg5[%c0_12, %c0_13] : memref<1x128xf32, #tpu.memory_space<vmem>>, vector<1x128xf32>
    %31 = vector.broadcast %30 : vector<1x128xf32> to vector<8x128xf32>
    %32 = arith.mulf %28, %31 : vector<8x128xf32>
    %cst_14 = arith.constant dense<0.000000e+00> : vector<8xf32>
    %33 = vector.multi_reduction <add>, %32, %cst_14 [1] : vector<8x128xf32> to vector<8xf32>
    %34 = vector.shape_cast %33 : vector<8xf32> to vector<8x1xf32>
    %c0_15 = arith.constant 0 : index
    %c0_16 = arith.constant 0 : index
    %35 = vector.load %arg6[%c0_15, %c0_16] : memref<1x1xf32, #tpu.memory_space<vmem>>, vector<1x1xf32>
    %36 = vector.broadcast %35 : vector<1x1xf32> to vector<8x1xf32>
    %37 = arith.addf %34, %36 : vector<8x1xf32>
    %c0_17 = arith.constant 0 : index
    %c0_18 = arith.constant 0 : index
    %38 = vector.load %arg7[%c0_17, %c0_18] : memref<8x1xf32, #tpu.memory_space<vmem>>, vector<8x1xf32>
    tpu.vector_store %arg7[%c0_17, %c0_18], %37 {strides = array<i32>} : memref<8x1xf32, #tpu.memory_space<vmem>>, vector<8x1xf32>,
    return
  }
  func.func @transform_0(%arg0: i32) -> (i32, i32) {
    %c0_i32 = arith.constant 0 : i32
    %c0_i32_0 = arith.constant 0 : i32
    return %arg0, %c0_i32 : i32, i32
  }
  func.func @transform_1(%arg0: i32) -> (i32, i32) {
    %c0_i32 = arith.constant 0 : i32
    %c0_i32_0 = arith.constant 0 : i32
    return %arg0, %c0_i32 : i32, i32
  }
  func.func @transform_2(%arg0: i32) -> (i32, i32) {
    %c0_i32 = arith.constant 0 : i32
    %c0_i32_0 = arith.constant 0 : i32
    %c0_i32_1 = arith.constant 0 : i32
    return %c0_i32, %c0_i32_0 : i32, i32
  }
  func.func @transform_3(%arg0: i32) -> (i32, i32) {
    %c0_i32 = arith.constant 0 : i32
    %c0_i32_0 = arith.constant 0 : i32
    %c0_i32_1 = arith.constant 0 : i32
    return %c0_i32, %c0_i32_0 : i32, i32
  }
  func.func @transform_4(%arg0: i32) -> (i32, i32) {
    %c0_i32 = arith.constant 0 : i32
    %c0_i32_0 = arith.constant 0 : i32
    %c0_i32_1 = arith.constant 0 : i32
    return %c0_i32, %c0_i32_0 : i32, i32
  }
  func.func @transform_5(%arg0: i32) -> (i32, i32) {
    %c0_i32 = arith.constant 0 : i32
    %c0_i32_0 = arith.constant 0 : i32
    %c0_i32_1 = arith.constant 0 : i32
    return %c0_i32, %c0_i32_0 : i32, i32
  }
  func.func @transform_6(%arg0: i32) -> (i32, i32) {
    %c0_i32 = arith.constant 0 : i32
    %c0_i32_0 = arith.constant 0 : i32
    return %arg0, %c0_i32 : i32, i32
  }
  func.func @transform_7(%arg0: i32) -> (i32, i32) {
    %c0_i32 = arith.constant 0 : i32
    %c0_i32_0 = arith.constant 0 : i32
    return %arg0, %c0_i32 : i32, i32
  }
}

</mosaic_0001>

<bundles_post_ra>
// kernel: decoder_forward.1
= control target key start
LH: loop header
LB: loop body
LE: loop exit
PB: predicated region body
PF: predicated region fallthrough
CT: control target
= control target key end

     0   :  { %s634_s0 = inlined_call_operand.vmem [shape: bf16[8,128], index: 0, kind: input, shape index: {}]   ;;  %s635_s1 = inlined_call_operand.vmem [shape: f32[8,128], index: 1, kind: input, shape index: {}]   ;;  %s636_s2 = inlined_call_operand.hbm [shape: bf16[128,512], index: 2, kind: input, shape index: {}]   ;;  %s637_s3 = inlined_call_operand.vmem [shape: f32[1,512], index: 3, kind: input, shape index: {}]   ;;  %s638_s4 = inlined_call_operand.vmem [shape: f32[1,128], index: 4, kind: input, shape index: {}]   ;;  %s639_s5 = inlined_call_operand.<no memory space> [shape: f32[1,1], index: 5, kind: input, shape index: {}]   ;;  %s640_s6 = inlined_call_operand.vmem [shape: f32[8,1], index: 6, kind: output, shape index: {0}]   ;;  %s641_s7 = inlined_call_operand.hbm [shape: f32[8,128], index: 7, kind: output, shape index: {1}]  }
   0x1   :  { %v13_v0 = vstv %s639_s5 }
   0x2   :  { %14 = vst [vmem:[#allocation2] sm:$0x1] %v13_v0 }
   0x3   :  { %15 = vsyncpa [#allocation4], 0 }
   0x4   :  { %16 = vsyncpa [#allocation5], 0  ;;  %s547_s26 = smov [#allocation3]   ;;  %s499_s30 = scalar_lea.hbm %s636_s2, 4096 }
   0x5   :  { %s26_s27 = sshll.u32 %s547_s26, 4  ;;  %p500_p0 = scmp.ne.s32.totalorder %s636_s2, %s499_s30  ;;  %s27_s27 = int_to_ptr.vmem [resolvable:$true] %s26_s27 }
   0x6   :  { %p503_p1 = scmp.lt.u32.totalorder %s499_s30, %s636_s2 }
   0x8   :  { %p505_p2 = pnand %p503_p1, %p500_p0 }
   0xa   :  { %508 = shalt.err (!%p505_p2)
}
   0xb   :  { %s509_s5 = scalar_lea.vmem %s27_s27, 4096  ;;  %p514_p4 = scmp.lt.s32.totalorder %s27_s27, %s27_s27 }
   0xc   :  { %p510_p3 = scmp.ne.s32.totalorder %s27_s27, %s509_s5  ;;  %p515_p5 = scmp.lt.s32.totalorder %s509_s5, %s509_s5 }
   0xe   :  { %p516_p6 = por %p515_p5, %p514_p4 }
  0x10   :  { %p517_p7 = pnand %p516_p6, %p510_p3 }
  0x12   :  { %520 = shalt.err (!%p517_p7)
}
  0x13   :  { %s548_s12 = smov 256   ;;  %s549_s13 = smov 16  }
  0x14   :  { %32 = dma.hbm_to_vmem [thread:$0]  %s636_s2, 4096, %s27_s27, [#allocation4], %s548_s12, %s548_s12, %s549_s13  }
  0x15   :  { %543 = dma.done.wait [#allocation4], 4096  }
  0x16   :  { %544 = vsyncadd [#allocation4], 4294963200  ;;  %v550_v1 = vmov 0   ;;  %v441_v2 = vld [vmem:[#allocation3 + $0x4] ss:$16 sps:$4 sm:$0xff]   ;;  %v78_v35 = vlaneseq  ;;  %s551_s21 = smov [#allocation6]  }
  0x17   :  { %290 = vmatprep.mubr.bf16.mxu0 %v550_v1  ;;  %331 = vmatprep.mubr.bf16.mxu1 %v550_v1  ;;  %v443_v3 = vld [vmem:[#allocation3] ss:$16 sps:$4 sm:$0xff]   ;;  %v444_v4 = vld [vmem:[#allocation3 + $0x24] ss:$16 sps:$4 sm:$0xff]   ;;  %v459_v9 = vld [vmem:[#allocation3 + $0xc] ss:$16 sps:$4 sm:$0xff]  }
  0x18   :  { %258 = vmatprep.subr.bf16.mxu0 %v441_v2  ;;  %v446_v5 = vld [vmem:[#allocation3 + $0x20] ss:$16 sps:$4 sm:$0xff]   ;;  %v447_v6 = vld [vmem:[#allocation3 + $0x44] ss:$16 sps:$4 sm:$0xff]   ;;  %v461_v10 = vld [vmem:[#allocation3 + $0x8] ss:$16 sps:$4 sm:$0xff]   ;;  %299 = vmatprep.subr.bf16.mxu1 %v459_v9 }
  0x19   :  { %259 = vmatpush1.bf16.msra.mxu0 %v443_v3  ;;  %v449_v7 = vld [vmem:[#allocation3 + $0x40] ss:$16 sps:$4 sm:$0xff]   ;;  %v450_v8 = vld [vmem:[#allocation3 + $0x64] ss:$16 sps:$4 sm:$0xff]   ;;  %300 = vmatpush1.bf16.msra.mxu1 %v461_v10  ;;  %v465_v12 = vld [vmem:[#allocation3 + $0x2c] ss:$16 sps:$4 sm:$0xff]  }
  0x1a   :  { %260 = vmatprep.subr.bf16.mxu0 %v444_v4  ;;  %v452_v11 = vld [vmem:[#allocation3 + $0x60] ss:$16 sps:$4 sm:$0xff]   ;;  %v467_v13 = vld [vmem:[#allocation3 + $0x28] ss:$16 sps:$4 sm:$0xff]   ;;  %v453_v14 = vld [vmem:[#allocation3 + $0x84] ss:$16 sps:$4 sm:$0xff]   ;;  %301 = vmatprep.subr.bf16.mxu1 %v465_v12 }
  0x1b   :  { %v455_v15 = vld [vmem:[#allocation3 + $0x80] ss:$16 sps:$4 sm:$0xff]   ;;  %v456_v16 = vld [vmem:[#allocation3 + $0xa4] ss:$16 sps:$4 sm:$0xff]   ;;  %v471_v17 = vld [vmem:[#allocation3 + $0x4c] ss:$16 sps:$4 sm:$0xff]  }
  0x1c   :  { %v473_v18 = vld [vmem:[#allocation3 + $0x48] ss:$16 sps:$4 sm:$0xff]   ;;  %v474_v19 = vld [vmem:[#allocation3 + $0x6c] ss:$16 sps:$4 sm:$0xff]   ;;  %v458_v20 = vld [vmem:[#allocation3 + $0xa0] ss:$16 sps:$4 sm:$0xff]  }
  0x1d   :  { %261 = vmatpush1.bf16.msra.mxu0 %v446_v5  ;;  %302 = vmatpush1.bf16.msra.mxu1 %v467_v13  ;;  %v462_v21 = vld [vmem:[#allocation3 + $0xc4] ss:$16 sps:$4 sm:$0xff]   ;;  %v476_v22 = vld [vmem:[#allocation3 + $0x68] ss:$16 sps:$4 sm:$0xff]   ;;  %v477_v23 = vld [vmem:[#allocation3 + $0x8c] ss:$16 sps:$4 sm:$0xff]  }
  0x1e   :  { %262 = vmatprep.subr.bf16.mxu0 %v447_v6  ;;  %303 = vmatprep.subr.bf16.mxu1 %v471_v17  ;;  %v464_v24 = vld [vmem:[#allocation3 + $0xc0] ss:$16 sps:$4 sm:$0xff]   ;;  %v479_v25 = vld [vmem:[#allocation3 + $0x88] ss:$16 sps:$4 sm:$0xff]   ;;  %v468_v26 = vld [vmem:[#allocation3 + $0xe4] ss:$16 sps:$4 sm:$0xff]  }
  0x1f   :  { %v480_v27 = vld [vmem:[#allocation3 + $0xac] ss:$16 sps:$4 sm:$0xff]   ;;  %v470_v28 = vld [vmem:[#allocation3 + $0xe0] ss:$16 sps:$4 sm:$0xff]   ;;  %v482_v29 = vld [vmem:[#allocation3 + $0xa8] ss:$16 sps:$4 sm:$0xff]  }
  0x20   :  { %v483_v30 = vld [vmem:[#allocation3 + $0xcc] ss:$16 sps:$4 sm:$0xff]   ;;  %v485_v32 = vld [vmem:[#allocation3 + $0xc8] ss:$16 sps:$4 sm:$0xff]   ;;  %v79_v36 = vshrl.u32 %v78_v35, 7  ;;  %s389_s22 = sshll.u32 %s551_s21, 4  ;;  %s390_s22 = int_to_ptr.vmem [resolvable:$true] %s389_s22 }
  0x21   :  { %263 = vmatpush1.bf16.msra.mxu0 %v449_v7  ;;  %304 = vmatpush1.bf16.msra.mxu1 %v473_v18  ;;  %v43_v31 = vld [vmem:[%s634_s0] sm:$0xf]  ;;  %v488_v34 = vld [vmem:[#allocation3 + $0xe8] ss:$16 sps:$4 sm:$0xff]   ;;  %s521_s23 = scalar_lea.vmem %s390_s22, 128  ;;  %p526_p9 = scmp.lt.s32.totalorder %s390_s22, %s390_s22 }
  0x22   :  { %264 = vmatprep.subr.bf16.mxu0 %v450_v8  ;;  %305 = vmatprep.subr.bf16.mxu1 %v474_v19  ;;  %v486_v33 = vld [vmem:[#allocation3 + $0xec] ss:$16 sps:$4 sm:$0xff]   ;;  %v80_v37 = vsub.s32 0, %v79_v36  ;;  %v84_v39 = vsub.s32 1, %v79_v36  ;;  %v92_v56 = vsub.s32 3, %v79_v36  ;;  %v88_v57 = vsub.s32 2, %v79_v36  ;;  %p522_p8 = scmp.ne.s32.totalorder %s390_s22, %s521_s23  ;;  %p527_p10 = scmp.lt.s32.totalorder %s521_s23, %s521_s23 }
  0x23   :  { %v76_v38 = vld [vmem:[%s637_s3] sm:$0xf] }
  0x24   :  { %v81_v40 = vrot.slane %v76_v38, %v80_v37  ;;  %v85_v42 = vrot.slane %v76_v38, %v84_v39  ;;  %v93_v58 = vrot.slane %v76_v38, %v92_v56  ;;  %v89_v61 = vrot.slane %v76_v38, %v88_v57  ;;  %v357_v4 = vld [vmem:[%s635_s1] sm:$0xff]  ;;  %p528_p11 = por %p527_p10, %p526_p9 }
  0x25   :  { %265 = vmatpush1.bf16.msra.mxu0 %v452_v11  ;;  %306 = vmatpush1.bf16.msra.mxu1 %v476_v22  ;;  %v434_v9 = vld [vmem:[%s638_s4] ss:$0 sm:$0xff] }
  0x26   :  { %266 = vmatprep.subr.bf16.mxu0 %v453_v14  ;;  %307 = vmatprep.subr.bf16.mxu1 %v477_v23  ;;  %p529_p12 = pnand %p528_p11, %p522_p8 }
  0x29   :  { %267 = vmatpush1.bf16.msra.mxu0 %v455_v15  ;;  %308 = vmatpush1.bf16.msra.mxu1 %v479_v25 }
  0x2a   :  { %268 = vmatprep.subr.bf16.mxu0 %v456_v16  ;;  %309 = vmatprep.subr.bf16.mxu1 %v480_v27 }
  0x2d   :  { %269 = vmatpush1.bf16.msra.mxu0 %v458_v20  ;;  %310 = vmatpush1.bf16.msra.mxu1 %v482_v29 }
  0x2e   :  { %270 = vmatprep.subr.bf16.mxu0 %v462_v21  ;;  %311 = vmatprep.subr.bf16.mxu1 %v483_v30 }
  0x31   :  { %271 = vmatpush1.bf16.msra.mxu0 %v464_v24  ;;  %312 = vmatpush1.bf16.msra.mxu1 %v485_v32 }
  0x32   :  { %272 = vmatprep.subr.bf16.mxu0 %v468_v26  ;;  %313 = vmatprep.subr.bf16.mxu1 %v486_v33 }
  0x35   :  { %273 = vmatpush1.bf16.msra.mxu0 %v470_v28  ;;  %314 = vmatpush1.bf16.msra.mxu1 %v488_v34 }
  0x38   :  { %291 = vmatmul.mubr.bf16.vlgmr.msra.gmra.mrb[0].mxu0 %v43_v31  ;;  %332 = vmatmul.mubr.bf16.vlgmr.msra.gmra.mrb[0].mxu1 %v43_v31 }
 0x10b   :  { %v292_v41 = vpop.f32.mrb[0].mxu0  ;;  %v333_v50 = vpop.f32.mrb[0].mxu1 }
 0x10c   :  { %v293_v43 = vadd.f32 %v292_v41, %v81_v40  ;;  %v294_v44 = vpop.f32.mrb[1].mxu0  ;;  %v335_v51 = vpop.f32.mrb[1].mxu1  ;;  %v334_v0 = vadd.f32 %v333_v50, %v89_v61 }
 0x10d   :  { %v296_v45 = vpop.f32.mrb[2].mxu0  ;;  %v295_v48 = vadd.f32 %v294_v44, %v85_v42  ;;  %v337_v52 = vpop.f32.mrb[2].mxu1  ;;  %v336_v62 = vadd.f32 %v335_v51, %v93_v58 }
 0x10e   :  { %v432_v46 = vmul.f32 -1.442695, %v293_v43  ;;  %v297_v47 = vpop.f32.mrb[3].mxu0  ;;  %v338_v53 = vpop.f32.mrb[3].mxu1 }
 0x10f   :  { %v433_v49 = vmul.f32 -1.442695, %v295_v48 }
 0x110   :  { %489 = vpow2.f32 %v432_v46 }
 0x111   :  { %491 = vpow2.f32 %v433_v49 }
 0x11a   :  { %v490_v54 = vpop.eup %489 }
 0x11b   :  { %v343_v55 = vadd.f32 1.0, %v490_v54  ;;  %v492_v59 = vpop.eup %491 }
 0x11c   :  { %v349_v60 = vadd.f32 1.0, %v492_v59 }
 0x11d   :  { %493 = vrcp.f32 %v343_v55 }
 0x11e   :  { %495 = vrcp.f32 %v349_v60 }
 0x127   :  { %v494_v63 = vpop.eup %493 }
 0x128   :  { %v352_v1 = vmul.f32 %v494_v63, %v336_v62  ;;  %v496_v3 = vpop.eup %495 }
 0x129   :  { %v355_v5 = vsub.f32 1.0, %v496_v3  ;;  %v358_v8 = vmul.f32 %v496_v3, %v357_v4 }
 0x12a   :  { %v353_v2 = vadd.f32 %v352_v1, %v334_v0 }
 0x12c   :  { %497 = vtanh.f32 %v353_v2 }
 0x136   :  { %v498_v6 = vpop.eup %497 }
 0x137   :  { %v356_v7 = vmul.f32 %v498_v6, %v355_v5 }
 0x139   :  { %v359_v10 = vadd.f32 %v358_v8, %v356_v7 }
 0x13b   :  { %v368_v11 = vmul.f32 %v434_v9, %v359_v10  ;;  %360 = vst [vmem:[#allocation6] sm:$0xff] %v359_v10 }
 0x13d   :  { %369 = vadd.xlane.f32.xlu0 %v368_v11 }
 0x13e   :  { %532 = shalt.err (!%p529_p12)
}
 0x13f   :  { %s533_s25 = scalar_lea.hbm %s641_s7, 128 }
 0x140   :  { %p534_p13 = scmp.ne.s32.totalorder %s641_s7, %s533_s25  ;;  %p537_p0 = scmp.lt.u32.totalorder %s533_s25, %s641_s7 }
 0x142   :  { %p539_p1 = pnand %p537_p0, %p534_p13 }
 0x144   :  { %542 = shalt.err (!%p539_p1)
}
 0x145   :  { %392 = dma.vmem_to_hbm [thread:$0]  %s390_s22, 128, %s641_s7, [#allocation5]   ;;  %v435_v12 = vld [vmem:[#allocation2] ss:$0 sm:$0xff]  ;;  %vm379_vm0 = vcmask 7168  }
 0x1ca   :  { %v370_v13 = vpop.xlane.xlu0 %369 }
 0x1cb   :  { %v378_v14 = vadd.f32 %v435_v12, %v370_v13 }
 0x1cd   :  { %380 = vst.msk [vmem:[%s640_s6] sm:$0xff] %vm379_vm0, %v378_v14 }
 0x1ce   :  { %545 = dma.done.wait [#allocation5], 128  }
 0x1cf   :  { %546 = vsyncadd [#allocation5], 4294967168 }
 0x1d0   :  { %398 = vsyncpa [#allocation4], 1 }
 0x1d1   :  { %399 = vsyncpa [#allocation5], 1 }

</bundles_post_ra>
